<compile_context>
chip_gen: v6e
topology: v6e:2x2x1
jax: 0.10.0
libtpu: 0.0.40
codegen_flags: <defaults>
</compile_context>

<pallas_src>
import functools

import jax
import jax.numpy as jnp
from jax.experimental import pallas as pl
from jax.experimental.pallas import tpu as pltpu


def _output_fused_kernel(x_ref, w1_ref, w2_ref, gamma_ref, beta_ref, out_ref,
                         x_stash, sum_sc, sumsq_sc, *,
                         width, span, inv_count, eps, slope, stash):
    """Fused conv1(1x1) -> batch stats -> BN -> LeakyReLU -> conv2(4x4 valid, C->1)."""
    phase = pl.program_id(0)
    n = pl.program_id(1)

    @pl.when(jnp.logical_and(phase == 0, n == 0))
    def _init():
        sum_sc[...] = jnp.zeros_like(sum_sc)
        sumsq_sc[...] = jnp.zeros_like(sumsq_sc)

    @pl.when(phase == 0)
    def _stats():
        # In-kernel cast (VPU) instead of a wrapper-side HBM copy of x.
        x = x_ref[...].astype(jnp.bfloat16)                      # (C, H*W)
        if stash:
            x_stash[n] = x                                       # keep x resident in VMEM
        # Conv2d 1x1 (no bias) == channel mix: (C,C)@(C,HW) on the MXU, f32 acc.
        a = jnp.dot(w1_ref[...], x, preferred_element_type=jnp.float32)
        sum_sc[...] += jnp.sum(a, axis=1, keepdims=True)
        sumsq_sc[...] += jnp.sum(a * a, axis=1, keepdims=True)

    @pl.when(phase == 1)
    def _apply():
        if stash:
            x = x_stash[n]                                       # no second HBM read
        else:
            x = x_ref[...].astype(jnp.bfloat16)
        # Recompute conv1 (cheaper than spilling the activation to HBM).
        a = jnp.dot(w1_ref[...], x, preferred_element_type=jnp.float32)

        # Fold batch statistics + affine params into per-channel scale/bias (f32).
        mean = sum_sc[...] * inv_count                           # (C, 1)
        var = jnp.maximum(sumsq_sc[...] * inv_count - mean * mean, 0.0)
        scale = gamma_ref[...] * jax.lax.rsqrt(var + eps)
        shift = beta_ref[...] - mean * scale

        y = a * scale + shift                                    # BatchNorm2d (training)
        y = jnp.where(y >= 0.0, y, slope * y)                    # LeakyReLU(0.2)

        # Conv2d 4x4 valid (C -> 1, no bias): contract channels for all 16 taps in one
        # MXU matmul, then 16 statically shifted-window adds on the VPU.
        taps = jnp.dot(w2_ref[...], y.astype(jnp.bfloat16),
                       preferred_element_type=jnp.float32)       # (16, H*W)
        acc = jnp.zeros((1, span), jnp.float32)
        for k in range(16):
            kh, kw = divmod(k, 4)
            start = kh * width + kw
            acc = acc + taps[k:k + 1, start:start + span]
        out_ref[...] = acc.astype(out_ref.dtype)


def output_forward(x_nchw, conv1_w_oihw, bn_gamma, bn_beta, conv2_w_oihw,
                   *, eps=1e-5, negative_slope=0.2):
    """Pallas implementation of Output.forward.  NCHW in, NCHW out."""
    N, C, H, W = x_nchw.shape
    assert conv1_w_oihw.shape == (C, C, 1, 1)
    assert conv2_w_oihw.shape == (1, C, 4, 4)
    assert H >= 4 and W >= 4
    HW = H * W
    Ho, Wo = H - 3, W - 3
    span = (Ho - 1) * W + Wo            # flat per-image output row (wrap cols cropped)

    # Channel-major, pixel-flattened view (free reshape).  NO wrapper-side dtype cast
    # or pad of x: the cast happens inside the kernel.
    x_flat = x_nchw.reshape(N, C, HW)
    w1 = conv1_w_oihw.reshape(C, C).astype(jnp.bfloat16)                     # (out, in)
    w2 = jnp.transpose(conv2_w_oihw[0], (1, 2, 0)).reshape(16, C).astype(jnp.bfloat16)
    gamma = bn_gamma.reshape(C, 1).astype(jnp.float32)
    beta = bn_beta.reshape(C, 1).astype(jnp.float32)

    # VMEM budget: stash the whole bf16 activation only if it (plus working set) fits.
    stash_bytes = N * C * HW * 2
    x_block_bytes = C * HW * x_flat.dtype.itemsize
    work_bytes = 2 * x_block_bytes + C * HW * 8 + 16 * HW * 4 + (2 << 20)
    use_stash = (stash_bytes + work_bytes) <= (48 << 20)
    est = work_bytes + (stash_bytes if use_stash else 0)
    vmem_limit = int(min(64 << 20, max(32 << 20, est + (4 << 20))))

    stash_shape = (N, C, HW) if use_stash else (8, 128)
    if use_stash:
        # Phase 1 maps every step to block 0 -> consecutive equal block indices, so the
        # pipeline skips the re-fetch and x is read from HBM only once per image.
        x_index_map = lambda p, n: (n * (1 - p), 0, 0)
    else:
        x_index_map = lambda p, n: (n, 0, 0)

    out_flat = pl.pallas_call(
        functools.partial(_output_fused_kernel, width=W, span=span,
                          inv_count=1.0 / (N * HW), eps=eps,
                          slope=negative_slope, stash=use_stash),
        grid=(2, N),                                    # (phase, batch)
        in_specs=[
            pl.BlockSpec((None, C, HW), x_index_map),
            pl.BlockSpec((C, C), lambda p, n: (0, 0)),
            pl.BlockSpec((16, C), lambda p, n: (0, 0)),
            pl.BlockSpec((C, 1), lambda p, n: (0, 0)),
            pl.BlockSpec((C, 1), lambda p, n: (0, 0)),
        ],
        out_specs=pl.BlockSpec((None, 1, span), lambda p, n: (n, 0, 0)),
        out_shape=jax.ShapeDtypeStruct((N, 1, span), jnp.float32),
        scratch_shapes=[
            pltpu.VMEM(stash_shape, jnp.bfloat16),      # resident x (or tiny dummy)
            pltpu.VMEM((C, 1), jnp.float32),            # per-channel sum
            pltpu.VMEM((C, 1), jnp.float32),            # per-channel sum of squares
        ],
        compiler_params=pltpu.CompilerParams(
            dimension_semantics=("arbitrary", "arbitrary"),
            vmem_limit_bytes=vmem_limit),
    )(x_flat, w1, w2, gamma, beta)

    # Crop the flat rows back to the valid (Ho, Wo) window and return NCHW.
    flat = jnp.pad(out_flat[:, 0, :], ((0, 0), (0, Ho * W - span)))
    out = flat.reshape(N, Ho, W)[:, :, :Wo]
    return out[:, None, :, :]                           # (N, 1, H-3, W-3)


def output_reference(x, conv1_w, gamma, beta, conv2_w, *, eps=1e-5, negative_slope=0.2):
    """Pure-JAX f32 reference mirroring the PyTorch forward semantics."""
    y = jax.lax.conv_general_dilated(
        x, conv1_w, window_strides=(1, 1), padding="VALID",
        dimension_numbers=("NCHW", "OIHW", "NCHW"),
        precision=jax.lax.Precision.HIGHEST)
    mean = jnp.mean(y, axis=(0, 2, 3), keepdims=True)
    var = jnp.mean((y - mean) ** 2, axis=(0, 2, 3), keepdims=True)
    y = (y - mean) * jax.lax.rsqrt(var + eps)
    y = y * gamma.reshape(1, -1, 1, 1) + beta.reshape(1, -1, 1, 1)
    y = jnp.where(y >= 0, y, negative_slope * y)
    return jax.lax.conv_general_dilated(
        y, conv2_w, window_strides=(1, 1), padding="VALID",
        dimension_numbers=("NCHW", "OIHW", "NCHW"),
        precision=jax.lax.Precision.HIGHEST)


if __name__ == "__main__":
    key = jax.random.PRNGKey(0)
    k1, k2, k3, k4, k5 = jax.random.split(key, 5)

    # feature_maps = 4; small shapes: (N, C, H, W) = (2, 4, 16, 16)
    N, C, H, W = 2, 4, 16, 16
    x = jax.random.normal(k1, (N, C, H, W), jnp.float32)
    conv1_w = 0.1 * jax.random.normal(k2, (C, C, 1, 1), jnp.float32)   # OIHW, bias=False
    conv2_w = 0.1 * jax.random.normal(k3, (1, C, 4, 4), jnp.float32)   # OIHW, bias=False
    gamma = 1.0 + 0.1 * jax.random.normal(k4, (C,), jnp.float32)       # BN weight
    beta = 0.1 * jax.random.normal(k5, (C,), jnp.float32)              # BN bias

    out = output_forward(x, conv1_w, gamma, beta, conv2_w)
    out = jax.block_until_ready(out)

    ref = output_reference(x, conv1_w, gamma, beta, conv2_w)
    assert out.shape == (N, 1, H - 3, W - 3), out.shape
    max_err = float(jnp.max(jnp.abs(out - ref)))
    assert jnp.allclose(out, ref, atol=3e-2, rtol=3e-2), max_err

    print("KERNEL_OK")
</pallas_src>

<mosaic_0001>
module attributes {stable_mosaic.version = 11 : i64} {
  func.func @_output_fused_kernel(%arg0: i32, %arg1: i32, %arg2: memref<1x4x256xf32, #tpu.memory_space<vmem>>, %arg3: memref<4x4xbf16, #tpu.memory_space<vmem>>, %arg4: memref<16x4xbf16, #tpu.memory_space<vmem>>, %arg5: memref<4x1xf32, #tpu.memory_space<vmem>>, %arg6: memref<4x1xf32, #tpu.memory_space<vmem>>, %arg7: memref<1x1x205xf32, #tpu.memory_space<vmem>>, %arg8: memref<2x4x256xbf16, #tpu.memory_space<vmem>>, %arg9: memref<4x1xf32, #tpu.memory_space<vmem>>, %arg10: memref<4x1xf32, #tpu.memory_space<vmem>>) attributes {dimension_semantics = [#tpu.dimension_semantics<arbitrary>, #tpu.dimension_semantics<arbitrary>], iteration_bounds = array<i64: 2, 2>, scalar_prefetch = 0 : i64, scratch_operands = 3 : i64, tpu.core_type = #tpu.core_type<tc>, window_params = [{transform_indices = @transform_0, window_bounds = array<i64: 1, 4, 256>}, {pipeline_mode = #tpu.pipeline_mode<synchronous>, transform_indices = @transform_1, window_bounds = array<i64: 4, 4>}, {pipeline_mode = #tpu.pipeline_mode<synchronous>, transform_indices = @transform_2, window_bounds = array<i64: 16, 4>}, {pipeline_mode = #tpu.pipeline_mode<synchronous>, transform_indices = @transform_3, window_bounds = array<i64: 4, 1>}, {pipeline_mode = #tpu.pipeline_mode<synchronous>, transform_indices = @transform_4, window_bounds = array<i64: 4, 1>}, {transform_indices = @transform_5, window_bounds = array<i64: 1, 1, 205>}]} {
    %c0_i32 = arith.constant 0 : i32
    %0 = arith.cmpi eq, %arg0, %c0_i32 : i32
    %c0_i32_0 = arith.constant 0 : i32
    %1 = arith.cmpi eq, %arg1, %c0_i32_0 : i32
    %2 = arith.andi %0, %1 : i1
    %3 = arith.extui %2 : i1 to i32
    %c0_i32_1 = arith.constant 0 : i32
    %4 = arith.cmpi ne, %3, %c0_i32_1 : i32
    scf.if %4 {
      %cst = arith.constant 0.000000e+00 : f32
      %11 = vector.broadcast %cst : f32 to vector<4x1xf32>
      %c0 = arith.constant 0 : index
      %c0_5 = arith.constant 0 : index
      %12 = vector.load %arg9[%c0, %c0_5] : memref<4x1xf32, #tpu.memory_space<vmem>>, vector<4x1xf32>
      tpu.vector_store %arg9[%c0, %c0_5], %11 {strides = array<i32>} : memref<4x1xf32, #tpu.memory_space<vmem>>, vector<4x1xf32>,
      %cst_6 = arith.constant 0.000000e+00 : f32
      %13 = vector.broadcast %cst_6 : f32 to vector<4x1xf32>
      %c0_7 = arith.constant 0 : index
      %c0_8 = arith.constant 0 : index
      %14 = vector.load %arg10[%c0_7, %c0_8] : memref<4x1xf32, #tpu.memory_space<vmem>>, vector<4x1xf32>
      tpu.vector_store %arg10[%c0_7, %c0_8], %13 {strides = array<i32>} : memref<4x1xf32, #tpu.memory_space<vmem>>, vector<4x1xf32>,
    } else {
    }
    %c0_i32_2 = arith.constant 0 : i32
    %5 = arith.cmpi eq, %arg0, %c0_i32_2 : i32
    %6 = arith.extui %5 : i1 to i32
    %c0_i32_3 = arith.constant 0 : i32
    %7 = arith.cmpi ne, %6, %c0_i32_3 : i32
    scf.if %7 {
      %c0 = arith.constant 0 : index
      %c0_5 = arith.constant 0 : index
      %c0_6 = arith.constant 0 : index
      %11 = vector.load %arg2[%c0, %c0_5, %c0_6] : memref<1x4x256xf32, #tpu.memory_space<vmem>>, vector<1x4x256xf32>
      %12 = vector.shape_cast %11 : vector<1x4x256xf32> to vector<4x256xf32>
      %13 = arith.truncf %12 : vector<4x256xf32> to vector<4x256xbf16>
      %14 = arith.index_cast %arg1 : i32 to index
      %c0_7 = arith.constant 0 : index
      %c0_8 = arith.constant 0 : index
      %15 = vector.load %arg8[%14, %c0_7, %c0_8] : memref<2x4x256xbf16, #tpu.memory_space<vmem>>, vector<1x4x256xbf16>
      %16 = vector.shape_cast %15 : vector<1x4x256xbf16> to vector<4x256xbf16>
      %17 = vector.shape_cast %13 : vector<4x256xbf16> to vector<1x4x256xbf16>
      tpu.vector_store %arg8[%14, %c0_7, %c0_8], %17 {strides = array<i32>} : memref<2x4x256xbf16, #tpu.memory_space<vmem>>, vector<1x4x256xbf16>,
      %c0_9 = arith.constant 0 : index
      %c0_10 = arith.constant 0 : index
      %18 = vector.load %arg3[%c0_9, %c0_10] : memref<4x4xbf16, #tpu.memory_space<vmem>>, vector<4x4xbf16>
      %cst = arith.constant dense<0.000000e+00> : vector<4x256xf32>
      %19 = tpu.matmul %18, %13, %cst {dimension_numbers = #tpu.dot_dimension_numbers<[1], [0], [0], [1], [0, 0, 1, 1], [], []>} : vector<4x4xbf16>, vector<4x256xbf16>, vector<4x256xf32> -> vector<4x256xf32>
      %c0_11 = arith.constant 0 : index
      %c0_12 = arith.constant 0 : index
      %20 = vector.load %arg9[%c0_11, %c0_12] : memref<4x1xf32, #tpu.memory_space<vmem>>, vector<4x1xf32>
      %cst_13 = arith.constant dense<0.000000e+00> : vector<4xf32>
      %21 = vector.multi_reduction <add>, %19, %cst_13 [1] : vector<4x256xf32> to vector<4xf32>
      %22 = vector.shape_cast %21 : vector<4xf32> to vector<4x1xf32>
      %23 = arith.addf %20, %22 : vector<4x1xf32>
      %c0_14 = arith.constant 0 : index
      %c0_15 = arith.constant 0 : index
      %24 = vector.load %arg9[%c0_14, %c0_15] : memref<4x1xf32, #tpu.memory_space<vmem>>, vector<4x1xf32>
      tpu.vector_store %arg9[%c0_14, %c0_15], %23 {strides = array<i32>} : memref<4x1xf32, #tpu.memory_space<vmem>>, vector<4x1xf32>,
      %c0_16 = arith.constant 0 : index
      %c0_17 = arith.constant 0 : index
      %25 = vector.load %arg10[%c0_16, %c0_17] : memref<4x1xf32, #tpu.memory_space<vmem>>, vector<4x1xf32>
      %26 = arith.mulf %19, %19 : vector<4x256xf32>
      %cst_18 = arith.constant dense<0.000000e+00> : vector<4xf32>
      %27 = vector.multi_reduction <add>, %26, %cst_18 [1] : vector<4x256xf32> to vector<4xf32>
      %28 = vector.shape_cast %27 : vector<4xf32> to vector<4x1xf32>
      %29 = arith.addf %25, %28 : vector<4x1xf32>
      %c0_19 = arith.constant 0 : index
      %c0_20 = arith.constant 0 : index
      %30 = vector.load %arg10[%c0_19, %c0_20] : memref<4x1xf32, #tpu.memory_space<vmem>>, vector<4x1xf32>
      tpu.vector_store %arg10[%c0_19, %c0_20], %29 {strides = array<i32>} : memref<4x1xf32, #tpu.memory_space<vmem>>, vector<4x1xf32>,
    } else {
    }
    %c1_i32 = arith.constant 1 : i32
    %8 = arith.cmpi eq, %arg0, %c1_i32 : i32
    %9 = arith.extui %8 : i1 to i32
    %c0_i32_4 = arith.constant 0 : i32
    %10 = arith.cmpi ne, %9, %c0_i32_4 : i32
    scf.if %10 {
      %11 = arith.index_cast %arg1 : i32 to index
      %c0 = arith.constant 0 : index
      %c0_5 = arith.constant 0 : index
      %12 = vector.load %arg8[%11, %c0, %c0_5] : memref<2x4x256xbf16, #tpu.memory_space<vmem>>, vector<1x4x256xbf16>
      %13 = vector.shape_cast %12 : vector<1x4x256xbf16> to vector<4x256xbf16>
      %c0_6 = arith.constant 0 : index
      %c0_7 = arith.constant 0 : index
      %14 = vector.load %arg3[%c0_6, %c0_7] : memref<4x4xbf16, #tpu.memory_space<vmem>>, vector<4x4xbf16>
      %cst = arith.constant dense<0.000000e+00> : vector<4x256xf32>
      %15 = tpu.matmul %14, %13, %cst {dimension_numbers = #tpu.dot_dimension_numbers<[1], [0], [0], [1], [0, 0, 1, 1], [], []>} : vector<4x4xbf16>, vector<4x256xbf16>, vector<4x256xf32> -> vector<4x256xf32>
      %c0_8 = arith.constant 0 : index
      %c0_9 = arith.constant 0 : index
      %16 = vector.load %arg9[%c0_8, %c0_9] : memref<4x1xf32, #tpu.memory_space<vmem>>, vector<4x1xf32>
      %cst_10 = arith.constant 0.001953125 : f32
      %17 = vector.broadcast %cst_10 : f32 to vector<4x1xf32>
      %18 = arith.mulf %16, %17 : vector<4x1xf32>
      %c0_11 = arith.constant 0 : index
      %c0_12 = arith.constant 0 : index
      %19 = vector.load %arg10[%c0_11, %c0_12] : memref<4x1xf32, #tpu.memory_space<vmem>>, vector<4x1xf32>
      %cst_13 = arith.constant 0.001953125 : f32
      %20 = vector.broadcast %cst_13 : f32 to vector<4x1xf32>
      %21 = arith.mulf %19, %20 : vector<4x1xf32>
      %22 = arith.mulf %18, %18 : vector<4x1xf32>
      %23 = arith.subf %21, %22 : vector<4x1xf32>
      %cst_14 = arith.constant 0.000000e+00 : f32
      %24 = vector.broadcast %cst_14 : f32 to vector<4x1xf32>
      %25 = arith.maximumf %23, %24 : vector<4x1xf32>
      %c0_15 = arith.constant 0 : index
      %c0_16 = arith.constant 0 : index
      %26 = vector.load %arg5[%c0_15, %c0_16] : memref<4x1xf32, #tpu.memory_space<vmem>>, vector<4x1xf32>
      %cst_17 = arith.constant 9.99999974E-6 : f32
      %27 = vector.broadcast %cst_17 : f32 to vector<4x1xf32>
      %28 = arith.addf %25, %27 : vector<4x1xf32>
      %29 = math.rsqrt %28 : vector<4x1xf32>
      %30 = arith.mulf %26, %29 : vector<4x1xf32>
      %c0_18 = arith.constant 0 : index
      %c0_19 = arith.constant 0 : index
      %31 = vector.load %arg6[%c0_18, %c0_19] : memref<4x1xf32, #tpu.memory_space<vmem>>, vector<4x1xf32>
      %32 = arith.mulf %18, %30 : vector<4x1xf32>
      %33 = arith.subf %31, %32 : vector<4x1xf32>
      %34 = vector.broadcast %30 : vector<4x1xf32> to vector<4x256xf32>
      %35 = arith.mulf %15, %34 : vector<4x256xf32>
      %36 = vector.broadcast %33 : vector<4x1xf32> to vector<4x256xf32>
      %37 = arith.addf %35, %36 : vector<4x256xf32>
      %cst_20 = arith.constant 0.000000e+00 : f32
      %38 = vector.broadcast %cst_20 : f32 to vector<4x256xf32>
      %39 = arith.cmpf oge, %37, %38 : vector<4x256xf32>
      %cst_21 = arith.constant 2.000000e-01 : f32
      %40 = vector.broadcast %cst_21 : f32 to vector<4x256xf32>
      %41 = arith.mulf %40, %37 : vector<4x256xf32>
      %42 = arith.select %39, %37, %41 : vector<4x256xi1>, vector<4x256xf32>
      %c0_22 = arith.constant 0 : index
      %c0_23 = arith.constant 0 : index
      %43 = vector.load %arg4[%c0_22, %c0_23] : memref<16x4xbf16, #tpu.memory_space<vmem>>, vector<16x4xbf16>
      %44 = arith.truncf %42 : vector<4x256xf32> to vector<4x256xbf16>
      %cst_24 = arith.constant dense<0.000000e+00> : vector<16x256xf32>
      %45 = tpu.matmul %43, %44, %cst_24 {dimension_numbers = #tpu.dot_dimension_numbers<[1], [0], [0], [1], [0, 0, 1, 1], [], []>} : vector<16x4xbf16>, vector<4x256xbf16>, vector<16x256xf32> -> vector<16x256xf32>
      %cst_25 = arith.constant 0.000000e+00 : f32
      %46 = vector.broadcast %cst_25 : f32 to vector<1x205xf32>
      %47 = vector.extract_strided_slice %45 {offsets = [0, 0], sizes = [1, 205], strides = [1, 1]} : vector<16x256xf32> to vector<1x205xf32>
      %48 = arith.addf %46, %47 : vector<1x205xf32>
      %49 = vector.extract_strided_slice %45 {offsets = [1, 1], sizes = [1, 205], strides = [1, 1]} : vector<16x256xf32> to vector<1x205xf32>
      %50 = arith.addf %48, %49 : vector<1x205xf32>
      %51 = vector.extract_strided_slice %45 {offsets = [2, 2], sizes = [1, 205], strides = [1, 1]} : vector<16x256xf32> to vector<1x205xf32>
      %52 = arith.addf %50, %51 : vector<1x205xf32>
      %53 = vector.extract_strided_slice %45 {offsets = [3, 3], sizes = [1, 205], strides = [1, 1]} : vector<16x256xf32> to vector<1x205xf32>
      %54 = arith.addf %52, %53 : vector<1x205xf32>
      %55 = vector.extract_strided_slice %45 {offsets = [4, 16], sizes = [1, 205], strides = [1, 1]} : vector<16x256xf32> to vector<1x205xf32>
      %56 = arith.addf %54, %55 : vector<1x205xf32>
      %57 = vector.extract_strided_slice %45 {offsets = [5, 17], sizes = [1, 205], strides = [1, 1]} : vector<16x256xf32> to vector<1x205xf32>
      %58 = arith.addf %56, %57 : vector<1x205xf32>
      %59 = vector.extract_strided_slice %45 {offsets = [6, 18], sizes = [1, 205], strides = [1, 1]} : vector<16x256xf32> to vector<1x205xf32>
      %60 = arith.addf %58, %59 : vector<1x205xf32>
      %61 = vector.extract_strided_slice %45 {offsets = [7, 19], sizes = [1, 205], strides = [1, 1]} : vector<16x256xf32> to vector<1x205xf32>
      %62 = arith.addf %60, %61 : vector<1x205xf32>
      %63 = vector.extract_strided_slice %45 {offsets = [8, 32], sizes = [1, 205], strides = [1, 1]} : vector<16x256xf32> to vector<1x205xf32>
      %64 = arith.addf %62, %63 : vector<1x205xf32>
      %65 = vector.extract_strided_slice %45 {offsets = [9, 33], sizes = [1, 205], strides = [1, 1]} : vector<16x256xf32> to vector<1x205xf32>
      %66 = arith.addf %64, %65 : vector<1x205xf32>
      %67 = vector.extract_strided_slice %45 {offsets = [10, 34], sizes = [1, 205], strides = [1, 1]} : vector<16x256xf32> to vector<1x205xf32>
      %68 = arith.addf %66, %67 : vector<1x205xf32>
      %69 = vector.extract_strided_slice %45 {offsets = [11, 35], sizes = [1, 205], strides = [1, 1]} : vector<16x256xf32> to vector<1x205xf32>
      %70 = arith.addf %68, %69 : vector<1x205xf32>
      %71 = vector.extract_strided_slice %45 {offsets = [12, 48], sizes = [1, 205], strides = [1, 1]} : vector<16x256xf32> to vector<1x205xf32>
      %72 = arith.addf %70, %71 : vector<1x205xf32>
      %73 = vector.extract_strided_slice %45 {offsets = [13, 49], sizes = [1, 205], strides = [1, 1]} : vector<16x256xf32> to vector<1x205xf32>
      %74 = arith.addf %72, %73 : vector<1x205xf32>
      %75 = vector.extract_strided_slice %45 {offsets = [14, 50], sizes = [1, 205], strides = [1, 1]} : vector<16x256xf32> to vector<1x205xf32>
      %76 = arith.addf %74, %75 : vector<1x205xf32>
      %77 = vector.extract_strided_slice %45 {offsets = [15, 51], sizes = [1, 205], strides = [1, 1]} : vector<16x256xf32> to vector<1x205xf32>
      %78 = arith.addf %76, %77 : vector<1x205xf32>
      %c0_26 = arith.constant 0 : index
      %c0_27 = arith.constant 0 : index
      %c0_28 = arith.constant 0 : index
      %79 = vector.load %arg7[%c0_26, %c0_27, %c0_28] : memref<1x1x205xf32, #tpu.memory_space<vmem>>, vector<1x1x205xf32>
      %80 = vector.shape_cast %79 : vector<1x1x205xf32> to vector<1x205xf32>
      %81 = vector.shape_cast %78 : vector<1x205xf32> to vector<1x1x205xf32>
      tpu.vector_store %arg7[%c0_26, %c0_27, %c0_28], %81 {strides = array<i32>} : memref<1x1x205xf32, #tpu.memory_space<vmem>>, vector<1x1x205xf32>,
    } else {
    }
    return
  }
  func.func @transform_0(%arg0: i32, %arg1: i32) -> (i32, i32, i32) {
    %c1_i32 = arith.constant 1 : i32
    %0 = arith.subi %c1_i32, %arg0 : i32
    %1 = arith.muli %arg1, %0 : i32
    %c0_i32 = arith.constant 0 : i32
    %c0_i32_0 = arith.constant 0 : i32
    %c0_i32_1 = arith.constant 0 : i32
    return %1, %c0_i32, %c0_i32_0 : i32, i32, i32
  }
  func.func @transform_1(%arg0: i32, %arg1: i32) -> (i32, i32) {
    %c0_i32 = arith.constant 0 : i32
    %c0_i32_0 = arith.constant 0 : i32
    %c0_i32_1 = arith.constant 0 : i32
    return %c0_i32, %c0_i32_0 : i32, i32
  }
  func.func @transform_2(%arg0: i32, %arg1: i32) -> (i32, i32) {
    %c0_i32 = arith.constant 0 : i32
    %c0_i32_0 = arith.constant 0 : i32
    %c0_i32_1 = arith.constant 0 : i32
    return %c0_i32, %c0_i32_0 : i32, i32
  }
  func.func @transform_3(%arg0: i32, %arg1: i32) -> (i32, i32) {
    %c0_i32 = arith.constant 0 : i32
    %c0_i32_0 = arith.constant 0 : i32
    %c0_i32_1 = arith.constant 0 : i32
    return %c0_i32, %c0_i32_0 : i32, i32
  }
  func.func @transform_4(%arg0: i32, %arg1: i32) -> (i32, i32) {
    %c0_i32 = arith.constant 0 : i32
    %c0_i32_0 = arith.constant 0 : i32
    %c0_i32_1 = arith.constant 0 : i32
    return %c0_i32, %c0_i32_0 : i32, i32
  }
  func.func @transform_5(%arg0: i32, %arg1: i32) -> (i32, i32, i32) {
    %c0_i32 = arith.constant 0 : i32
    %c0_i32_0 = arith.constant 0 : i32
    %c0_i32_1 = arith.constant 0 : i32
    return %arg1, %c0_i32, %c0_i32_0 : i32, i32, i32
  }
}

</mosaic_0001>

<bundles_post_ra>
// kernel: tpu_custom_call.1
= control target key start
LH: loop header
LB: loop body
LE: loop exit
PB: predicated region body
PF: predicated region fallthrough
CT: control target
= control target key end

     0   :  { %10 = vsyncpa [#allocation6], 0  ;;  %s1266_s0 = inlined_call_operand.vmem [shape: f32[2,4,256], index: 0, kind: input, shape index: {}]   ;;  %s1267_s1 = inlined_call_operand.vmem [shape: bf16[4,4], index: 1, kind: input, shape index: {}]   ;;  %s1268_s2 = inlined_call_operand.vmem [shape: bf16[16,4], index: 2, kind: input, shape index: {}]   ;;  %s1269_s3 = inlined_call_operand.vmem [shape: f32[4,1], index: 3, kind: input, shape index: {}]   ;;  %s1270_s4 = inlined_call_operand.vmem [shape: f32[4,1], index: 4, kind: input, shape index: {}]   ;;  %s1271_s5 = inlined_call_operand.hbm [shape: f32[2,1,205], index: 5, kind: output, shape index: {}]  }
   0x1   :  { %12 = vsyncpa [#allocation6 + $0x1], 0  ;;  %s1089_s18 = smov 0   ;;  %s1091_s19 = smov 0  }
   0x2   :  { %s1093_s20 = smov 0   ;;  %s1095_s21 = smov 0  }
   0x3   :  { %s1097_s22 = smov 0   ;;  %s1099_s23 = smov 0  }
   0x4   :  { %s1101_s24 = smov 0   ;;  %s1103_s25 = smov 0  }
   0x5 LB: > { %s817_s26 = sadd.s32 4294967295, %s1037_s25   ;;  %s818_s27 = sadd.s32 4294967294, %s1037_s25   ;;  %s1037_s25 = sphi %s1103_s25, %s18_s25   ;;  %s1033_s24 = sphi %s1101_s24, %s1280_s24   ;;  %s1029_s23 = sphi %s1099_s23, %s1279_s23   ;;  %s1025_s22 = sphi %s1097_s22, %s1278_s22   ;;  %s1021_s21 = sphi %s1095_s21, %s1277_s21   ;;  %s1017_s20 = sphi %s1093_s20, %s1276_s20   ;;  %s1013_s19 = sphi %s1091_s19, %s1275_s19   ;;  %s1009_s18 = sphi %s1089_s18, %s1274_s18  }
   0x6   : > { %s27_s28 = sadd.s32 1, %s1029_s23  ;;  %s30_s29 = sadd.s32 1, %s1033_s24 }
   0x7   : > { %p28_p0 = scmp.ge.s32.totalorder %s27_s28, 2  ;;  %s151_s30 = sadd.s32 1, %s1017_s20 }
   0x8   : > { %p161_p1 = scmp.ne.s32.totalorder %s1017_s20, %s1013_s19  ;;  %p162_p2 = scmp.eq.s32.totalorder %s817_s26, 3 }
   0x9   : > { %s1282_s28 = smov (%p28_p0, %s27_s28), 0  ;;  %s1284_s29 = smov (!%p28_p0, %s30_s29), %s1033_s24 }
   0xa   : > { %s148_s6 = ssub.s32 %s1029_s23, %s1282_s28  ;;  %p1141_p3 = por %p162_p2, %p161_p1 }
   0xb   : > { %p32_p4 = scmp.ge.s32.totalorder %s1284_s29, 2  ;;  %p149_p5 = scmp.eq.s32.totalorder %s148_s6, 0 }
   0xc   : > { %p167_p6 = scmp.ne.s32.totalorder %s1013_s19, %s1009_s18  ;;  %p168_p7 = scmp.eq.s32.totalorder %s818_s27, 3 }
   0xd   : > { %s1286_s29 = smov (%p32_p4, %s1284_s29), 0  ;;  %p821_p9 = scmp.ge.s32.totalorder %s1037_s25, 1 }
   0xe   : > { %s1150_s8 = scalar_select %p149_p5, %s1017_s20, %s151_s30  }
   0xf   : > { %p1152_p8 = por %p168_p7, %p167_p6  ;;  %p210_p10 = scmp.lt.s32.totalorder %s1037_s25, 5 }
  0x11   : > { %p211_p11 = pnand %p821_p9, %p210_p10 }
  0x12   : > { %s237_s10 = sand.u32 (!%p211_p11), 1, %s1013_s19   ;;  %s240_s11 = ssub.s32 (!%p211_p11), 1, %s1025_s22 }
  0x13   : > { %214 = sbr.rel (%p211_p11) target bundleno = 1017 (0x3f9), region = 40  ;;  %s1162_s12 = sshll.u32 (!%p211_p11), %s237_s10, 1 }
  0x14   : > { %s241_s13 = smul.u32 (!%p211_p11), %s1021_s21, %s240_s11  ;;  %p250_p12 = scmp.eq.s32.totalorder (!%p211_p11), %s1025_s22, 0 }
  0x15   : > { %p251_p0 = scmp.eq.s32.totalorder (!%p211_p11), %s1021_s21, 0  ;;  %s239_s26 = scalar_lea.vmem (!%p211_p11), [#allocation5], %s1162_s12 }
  0x16   : > { %p242_p13 = scmp.lt.s32.totalorder (!%p211_p11), %s241_s13, 1 }
  0x17   : > { %p252_p1 = pnand (!%p211_p11), %p251_p0, %p250_p12 }
  0x18   : > { %s1288_s13 = smov (!%p242_p13, %s241_s13), 1 }
  0x19   : > { %s846_s14 = sshll.u32 %s1288_s13, 3  ;;  %255 = sbr.rel (%p252_p1) target bundleno = 32 (0x20), region = 44 }
  0x1a   : > { %s246_s17 = scalar_lea.vmem %s1266_s0, %s846_s14 }
  0x1e   : > { %vm256_vm0 = vcmask 3072   ;;  %v1039_v0 = vmov 0.0  }
  0x1f   : > { %257 = vst.msk [vmem:[#allocation3] sm:$0xf] %vm256_vm0, %v1039_v0  ;;  %258 = vst.msk [vmem:[#allocation4] sm:$0xf] %vm256_vm0, %v1039_v0 }
  0x20 PF: > { %p825_p2 = scmp.ne.s32.totalorder %s1025_s22, 0 }
  0x21   : > { %s847_s27 = sshll.u32 (!%p825_p2), %s1021_s21, 2 }
  0x22   : > { %261 = sbr.rel (%p825_p2) target bundleno = 391 (0x187), region = 48  ;;  %s281_s30 = scalar_lea.vmem (!%p825_p2), [#allocation2], %s847_s27 }
  0x27   : > { %v262_v1 = vld [vmem:[%s246_s17] sm:$0xff]  ;;  %vm288_vm1 = vcmask 1041408   ;;  %v1040_v4 = vmov 0   ;;  %vm284_vm2 = vcmask 31744   ;;  %vm337_vm3 = vcmask 1043456  }
  0x28   : > { %v264_v2 = vcombine.high %v262_v1, %v262_v1  ;;  %v266_v3 = vpack.c.bf16 %v262_v1, %v262_v1  ;;  %327 = vmatprep.mubr.bf16.mxu0 %v1040_v4  ;;  %v283_v8 = vld [vmem:[%s1267_s1] sm:$0x3]  ;;  %v336_v21 = vld [vmem:[#allocation3] sm:$0xf]  ;;  %vm344_vm4 = vcmask 3072  }
  0x29   : > { %v346_v24 = vld [vmem:[#allocation4] sm:$0xf] }
  0x2a   : > { %v267_v5 = vpack.c.bf16 %v264_v2, %v264_v2  ;;  %v826_v6 = vpack.c.bf16 %v264_v2, %v262_v1  ;;  %v290_v7 = vsel %vm288_vm1, %v266_v3, 0 }
  0x2c   : > { %829 = vst.sshfl [vmem:[%s281_s30] sm:$0x33 pattern:$0x76325410] %v826_v6  ;;  %830 = vmatprep.subr.msk.bf16.mxu0 %vm288_vm1, %v267_v5 }
  0x2d   : > { %310 = vmatpush1.bf16.msra.mxu0 %v290_v7 }
  0x30   : > { %831 = vmatmul.mubr.msk.bf16.vlgmr.msra.gmra.mxu0 %vm284_vm2, %v283_v8 }
  0xf0   : > { %v329_v9 = vpop.f32.mrf.mxu0 }
  0xf1   : > { %v347_v11 = vmul.f32 %v329_v9, %v329_v9  ;;  %v338_v13 = vsel %vm337_vm3, %v329_v9, 0.0 }
  0xf2   : > { %v331_v10 = vpop.f32.mrf.mxu0 }
  0xf3   : > { %v348_v12 = vmul.f32 %v331_v10, %v331_v10  ;;  %v339_v14 = vsel %vm337_vm3, %v331_v10, 0.0  ;;  %v349_v19 = vsel %vm337_vm3, %v347_v11, 0.0 }
  0xf4   : > { %v333_v15 = vpop.f32.mrf.mxu0  ;;  %v340_v16 = vadd.f32 %v339_v14, %v338_v13 }
  0xf5   : > { %v350_v17 = vsel %vm337_vm3, %v348_v12, 0.0 }
  0xf6   : > { %341 = vadd.xlane.f32.xlu0 %v340_v16  ;;  %v334_v18 = vpop.f32.mrf.mxu0  ;;  %v351_v20 = vadd.f32 %v350_v17, %v349_v19 }
  0xfa   : > { %352 = vadd.xlane.f32.xlu0 %v351_v20 }
 0x17f   : > { %v342_v22 = vpop.xlane.xlu0 %341 }
 0x180   : > { %v343_v23 = vadd.f32 %v342_v22, %v336_v21 }
 0x182   : > { %345 = vst.msk [vmem:[#allocation3] sm:$0xf] %vm344_vm4, %v343_v23 }
 0x183   : > { %v353_v25 = vpop.xlane.xlu0 %352 }
 0x184   : > { %v354_v26 = vadd.f32 %v353_v25, %v346_v24 }
 0x186   : > { %355 = vst.msk [vmem:[#allocation4] sm:$0xf] %vm344_vm4, %v354_v26 }
 0x187 PF: > { %p832_p4 = scmp.ne.s32.totalorder %s1025_s22, 1 }
 0x188   : > { %s848_s13 = sshll.u32 (!%p832_p4), %s1021_s21, 2  ;;  %s1044_s22 = smov (!%p832_p4), 125  }
 0x189   : > { %359 = sbr.rel (%p832_p4) target bundleno = 994 (0x3e2), region = 52  ;;  %s362_s14 = scalar_lea.vmem (!%p832_p4), [#allocation2], %s848_s13 }
 0x18a   : > { %s1042_s13 = smov (!%p832_p4), 126   ;;  %s1045_s15 = smov (!%p832_p4), 112  }
 0x18b   : > { %s1046_s16 = smov (!%p832_p4), 111   ;;  %s1047_s17 = smov (!%p832_p4), 110  }
 0x18c   : > { %s1048_s27 = smov (!%p832_p4), 109   ;;  %s1049_s30 = smov (!%p832_p4), 96  }
 0x18d   : > { %s1050_s6 = smov (!%p832_p4), 95   ;;  %s1051_s11 = smov (!%p832_p4), 94  }
 0x18e   : > { %vm378_vm5 = vcmask 1041408   ;;  %v1041_v27 = vmov 0   ;;  %v426_v28 = vld [vmem:[#allocation3] sm:$0xf]  ;;  %v428_v29 = vld [vmem:[#allocation4] sm:$0xf] }
 0x18f   : > { %417 = vmatprep.mubr.bf16.mxu0 %v1041_v27  ;;  %941 = vset.pattern.permute.xlu0 %v1041_v27  ;;  %v835_v30 = vld.sshfl [vmem:[%s362_s14] sm:$0x33 pattern:$0x76325410]  ;;  %v427_v31 = vmul.f32 0.001953125, %v426_v28  ;;  %v429_v32 = vmul.f32 0.001953125, %v428_v29 }
 0x190   : > { %510 = vmatprep.mubr.bf16.mxu1 %v1041_v27  ;;  %v373_v33 = vcombine.high %v835_v30, %v835_v30  ;;  %v380_v34 = vsel %vm378_vm5, %v835_v30, 0  ;;  %v364_v36 = vld [vmem:[%s1267_s1] sm:$0x3]  ;;  %vm374_vm6 = vcmask 31744   ;;  %s1043_s14 = smov 127   ;;  %vm531_vm9 = vcmask 1039360  }
 0x191   : > { %v430_v35 = vmul.f32 %v427_v31, %v427_v31  ;;  %v433_v40 = vld [vmem:[%s1269_s3] sm:$0xf]  ;;  %vm543_vm10 = vcmask 1031168   ;;  %vm555_vm11 = vcmask 1022976   ;;  %vm567_vm12 = vcmask 916480  }
 0x192   : > { %836 = vmatprep.subr.msk.bf16.mxu0 %vm378_vm5, %v373_v33  ;;  %v437_v43 = vld [vmem:[%s1270_s4] sm:$0xf]  ;;  %vm579_vm13 = vcmask 908288   ;;  %vm591_vm14 = vcmask 900096   ;;  %vm603_vm15 = vcmask 891904   ;;  %vm615_vm0 = vcmask 785408  }
 0x193   : > { %400 = vmatpush1.bf16.msra.mxu0 %v380_v34  ;;  %v431_v37 = vsub.f32 %v429_v32, %v430_v35  ;;  %v942_v63 = vld [vmem:[%s1268_s2] sm:$0xff]   ;;  %vm627_vm1 = vcmask 777216   ;;  %vm639_vm2 = vcmask 769024   ;;  %vm651_vm3 = vcmask 760832  }
 0x194   : > { %vm663_vm4 = vcmask 654336  }
 0x195   : > { %v432_v38 = vmax.f32 %v431_v37, 0.0 }
 0x196   : > { %837 = vmatmul.mubr.msk.bf16.vlgmr.msra.gmra.mxu0 %vm374_vm6, %v364_v36 }
 0x197   : > { %v434_v39 = vadd.f32 1e-05, %v432_v38 }
 0x199   : > { %943 = vrsqrt.f32 %v434_v39 }
 0x1a6   : > { %v944_v41 = vpop.eup %943 }
 0x1a7   : > { %v436_v42 = vmul.f32 %v944_v41, %v433_v40 }
 0x1a9   : > { %v438_v44 = vmul.f32 %v436_v42, %v427_v31  ;;  %442 = vperm.xlu0 %941, %v436_v42  }
 0x1ab   : > { %v439_v45 = vsub.f32 %v437_v43, %v438_v44 }
 0x1ad   : > { %449 = vperm.xlu0 %941, %v439_v45  }
 0x224   : > { %v443_v46 = vpop.permute.xlu0 %442 }
 0x228   : > { %v450_v49 = vpop.permute.xlu0 %449 }
 0x256   : > { %v419_v47 = vpop.f32.mrf.mxu0 }
 0x257   : > { %v445_v48 = vmul.f32 %v443_v46, %v419_v47 }
 0x258   : > { %v421_v50 = vpop.f32.mrf.mxu0 }
 0x259   : > { %v452_v51 = vadd.f32 %v450_v49, %v445_v48  ;;  %v446_v52 = vmul.f32 %v443_v46, %v421_v50 }
 0x25a   : > { %v423_v53 = vpop.f32.mrf.mxu0 }
 0x25b   : > { %v456_v54 = vmul.f32 0.2, %v452_v51  ;;  %v453_v55 = vadd.f32 %v450_v49, %v446_v52  ;;  %vm454_vm7 = vcmp.ge.f32.partialorder %v452_v51, 0.0 }
 0x25c   : > { %v424_v56 = vpop.f32.mrf.mxu0 }
 0x25d   : > { %vm455_vm8 = vcmp.ge.f32.partialorder %v453_v55, 0.0  ;;  %v457_v57 = vmul.f32 0.2, %v453_v55  ;;  %v458_v58 = vsel %vm454_vm7, %v452_v51, %v456_v54  ;;  %vm699_vm7 = vcmask 629760  }
 0x25e   : > { %v462_v59 = vpack.c.bf16 %v458_v58, %v458_v58 }
 0x25f   : > { %v459_v60 = vsel %vm455_vm8, %v453_v55, %v457_v57 }
 0x260   : > { %v463_v61 = vpack.c.bf16 %v459_v60, %v459_v60  ;;  %v473_v62 = vsel %vm378_vm5, %v462_v59, 0 }
 0x262   : > { %839 = vmatprep.subr.msk.bf16.mxu1 %vm378_vm5, %v463_v61  ;;  %vm675_vm5 = vcmask 646144  }
 0x263   : > { %493 = vmatpush1.bf16.msra.mxu1 %v473_v62 }
 0x266   : > { %840 = vmatmul.mubr.msk.bf16.vlgmr.msra.gmra.mxu1 %vm374_vm6, %v942_v63  ;;  %vm687_vm6 = vcmask 637952  }
 0x326   : > { %v1196_v0 = vpop.f32.mrf.mxu1 }
 0x327   : > { %v537_v1 = vrot.slane %v1196_v0, 2  ;;  %v525_v2 = vrot.slane %v1196_v0, 1  ;;  %v549_v4 = vrot.slane %v1196_v0, 3  ;;  %v561_v6 = vrot.slane %v1196_v0, 4 }
 0x328   : > { %v1200_v3 = vpop.f32.mrf.mxu1  ;;  %v573_v8 = vrot.slane %v1196_v0, 5  ;;  %v585_v10 = vrot.slane %v1196_v0, 6  ;;  %v597_v12 = vrot.slane %v1196_v0, 7 }
 0x329   : > { %539 = vrot.lane.b32.xlu0 %v537_v1, %s1042_s13  ;;  %527 = vrot.lane.b32.xlu1 %v525_v2, %s1043_s14  ;;  %v526_v5 = vrot.slane %v1200_v3, 1  ;;  %v538_v7 = vrot.slane %v1200_v3, 2  ;;  %v550_v9 = vrot.slane %v1200_v3, 3  ;;  %v562_v11 = vrot.slane %v1200_v3, 4 }
 0x32a   : > { %v574_v13 = vrot.slane %v1200_v3, 5  ;;  %v586_v14 = vrot.slane %v1200_v3, 6  ;;  %v516_v15 = vpop.f32.mrf.mxu1  ;;  %v598_v16 = vrot.slane %v1200_v3, 7 }
 0x32b   : > { %v621_v17 = vrot.slane %v516_v15, 1  ;;  %v633_v18 = vrot.slane %v516_v15, 2  ;;  %v645_v20 = vrot.slane %v516_v15, 3  ;;  %v657_v22 = vrot.slane %v516_v15, 4 }
 0x32c   : > { %v518_v19 = vpop.f32.mrf.mxu1  ;;  %v669_v24 = vrot.slane %v516_v15, 5  ;;  %v681_v26 = vrot.slane %v516_v15, 6  ;;  %v693_v28 = vrot.slane %v516_v15, 7 }
 0x32d   : > { %551 = vrot.lane.b32.xlu0 %v549_v4, %s1044_s22  ;;  %529 = vrot.lane.b32.xlu1 %v526_v5, %s1043_s14  ;;  %v622_v21 = vrot.slane %v518_v19, 1  ;;  %v634_v23 = vrot.slane %v518_v19, 2  ;;  %s1053_s14 = smov 80   ;;  %v646_v25 = vrot.slane %v518_v19, 3  ;;  %v658_v27 = vrot.slane %v518_v19, 4 }
 0x32e   : > { %v670_v29 = vrot.slane %v518_v19, 5  ;;  %v682_v30 = vrot.slane %v518_v19, 6  ;;  %v694_v31 = vrot.slane %v518_v19, 7 }
 0x331   : > { %563 = vrot.lane.b32.xlu0 %v561_v6, %s1045_s15  ;;  %541 = vrot.lane.b32.xlu1 %v538_v7, %s1042_s13  ;;  %s1052_s13 = smov 93  }
 0x335   : > { %575 = vrot.lane.b32.xlu0 %v573_v8, %s1046_s16  ;;  %553 = vrot.lane.b32.xlu1 %v550_v9, %s1044_s22  ;;  %s1054_s22 = smov 79  }
 0x339   : > { %587 = vrot.lane.b32.xlu0 %v585_v10, %s1047_s17  ;;  %565 = vrot.lane.b32.xlu1 %v562_v11, %s1045_s15  ;;  %s1055_s15 = smov 78  }
 0x33d   : > { %599 = vrot.lane.b32.xlu0 %v597_v12, %s1048_s27  ;;  %577 = vrot.lane.b32.xlu1 %v574_v13, %s1046_s16  ;;  %s1056_s16 = smov 77  }
 0x341   : > { %589 = vrot.lane.b32.xlu1 %v586_v14, %s1047_s17  ;;  %611 = vrot.lane.b32.xlu0 %v516_v15, %s1049_s30 }
 0x345   : > { %601 = vrot.lane.b32.xlu1 %v598_v16, %s1048_s27  ;;  %623 = vrot.lane.b32.xlu0 %v621_v17, %s1050_s6 }
 0x349   : > { %635 = vrot.lane.b32.xlu0 %v633_v18, %s1051_s11  ;;  %613 = vrot.lane.b32.xlu1 %v518_v19, %s1049_s30 }
 0x34d   : > { %647 = vrot.lane.b32.xlu0 %v645_v20, %s1052_s13  ;;  %625 = vrot.lane.b32.xlu1 %v622_v21, %s1050_s6 }
 0x351   : > { %659 = vrot.lane.b32.xlu0 %v657_v22, %s1053_s14  ;;  %637 = vrot.lane.b32.xlu1 %v634_v23, %s1051_s11 }
 0x355   : > { %671 = vrot.lane.b32.xlu0 %v669_v24, %s1054_s22  ;;  %649 = vrot.lane.b32.xlu1 %v646_v25, %s1052_s13 }
 0x359   : > { %683 = vrot.lane.b32.xlu0 %v681_v26, %s1055_s15  ;;  %661 = vrot.lane.b32.xlu1 %v658_v27, %s1053_s14 }
 0x35d   : > { %695 = vrot.lane.b32.xlu0 %v693_v28, %s1056_s16  ;;  %673 = vrot.lane.b32.xlu1 %v670_v29, %s1054_s22  ;;  %v1057_v29 = vmov 1966171168  }
 0x361   : > { %685 = vrot.lane.b32.xlu1 %v682_v30, %s1055_s15  ;;  %v709_v30 = vunpack.c.l.s4 %v1057_v29 }
 0x365   : > { %697 = vrot.lane.b32.xlu1 %v694_v31, %s1056_s16  ;;  %v711_v31 = vlaneseq }
 0x367   : > { %vm725_vm8 = vcmp.lt.s32.totalorder %v711_v31, 205 }
 0x39b   : > { %v540_v32 = vpop.permute.xlu0 %539  ;;  %v528_v33 = vpop.permute.xlu1 %527 }
 0x39f   : > { %v552_v34 = vpop.permute.xlu0 %551  ;;  %v530_v35 = vpop.permute.xlu1 %529 }
 0x3a0   : > { %v532_v48 = vsel %vm531_vm9, %v528_v33, %v530_v35  ;;  %v536_v51 = vadd.f32 %v530_v35, %v1200_v3 }
 0x3a1   : > { %v535_v53 = vadd.f32 %v532_v48, %v1196_v0 }
 0x3a3   : > { %v564_v36 = vpop.permute.xlu0 %563  ;;  %v542_v37 = vpop.permute.xlu1 %541 }
 0x3a4   : > { %v544_v52 = vsel %vm543_vm10, %v540_v32, %v542_v37  ;;  %v548_v54 = vadd.f32 %v542_v37, %v536_v51 }
 0x3a5   : > { %v547_v56 = vadd.f32 %v544_v52, %v535_v53 }
 0x3a7   : > { %v576_v38 = vpop.permute.xlu0 %575  ;;  %v554_v39 = vpop.permute.xlu1 %553 }
 0x3a8   : > { %v556_v55 = vsel %vm555_vm11, %v552_v34, %v554_v39  ;;  %v560_v59 = vadd.f32 %v554_v39, %v548_v54  ;;  %v710_v39 = vunpack.c.0.s8 %v709_v30 }
 0x3a9   : > { %v559_v61 = vadd.f32 %v556_v55, %v547_v56 }
 0x3ab   : > { %v588_v40 = vpop.permute.xlu0 %587  ;;  %v566_v41 = vpop.permute.xlu1 %565 }
 0x3ac   : > { %v568_v60 = vsel %vm567_vm12, %v564_v36, %v566_v41  ;;  %v572_v62 = vadd.f32 %v566_v41, %v560_v59 }
 0x3ad   : > { %v571_v1 = vadd.f32 %v568_v60, %v559_v61 }
 0x3af   : > { %v600_v42 = vpop.permute.xlu0 %599  ;;  %v578_v43 = vpop.permute.xlu1 %577 }
 0x3b0   : > { %v580_v63 = vsel %vm579_vm13, %v576_v38, %v578_v43  ;;  %v584_v3 = vadd.f32 %v578_v43, %v572_v62 }
 0x3b1   : > { %v583_v5 = vadd.f32 %v580_v63, %v571_v1 }
 0x3b3   : > { %v590_v44 = vpop.permute.xlu1 %589  ;;  %v612_v45 = vpop.permute.xlu0 %611 }
 0x3b4   : > { %v592_v4 = vsel %vm591_vm14, %v588_v40, %v590_v44  ;;  %v596_v6 = vadd.f32 %v590_v44, %v584_v3  ;;  %v712_v40 = vshrl.u32 %v711_v31, 7 }
 0x3b5   : > { %v595_v8 = vadd.f32 %v592_v4, %v583_v5 }
 0x3b7   : > { %v602_v46 = vpop.permute.xlu1 %601  ;;  %v624_v47 = vpop.permute.xlu0 %623 }
 0x3b8   : > { %v604_v7 = vsel %vm603_vm15, %v600_v42, %v602_v46  ;;  %v608_v10 = vadd.f32 %v602_v46, %v596_v6 }
 0x3b9   : > { %v607_v12 = vadd.f32 %v604_v7, %v595_v8 }
 0x3bb   : > { %v636_v49 = vpop.permute.xlu0 %635  ;;  %v614_v50 = vpop.permute.xlu1 %613 }
 0x3bc   : > { %v616_v11 = vsel %vm615_vm0, %v612_v45, %v614_v50  ;;  %v620_v13 = vadd.f32 %v614_v50, %v608_v10 }
 0x3bd   : > { %v619_v15 = vadd.f32 %v616_v11, %v607_v12 }
 0x3bf   : > { %v648_v57 = vpop.permute.xlu0 %647  ;;  %v626_v58 = vpop.permute.xlu1 %625 }
 0x3c0   : > { %v628_v14 = vsel %vm627_vm1, %v624_v47, %v626_v58  ;;  %v632_v18 = vadd.f32 %v626_v58, %v620_v13  ;;  %v713_v47 = vsub.s32 %v710_v39, %v712_v40 }
 0x3c1   : > { %v631_v20 = vadd.f32 %v628_v14, %v619_v15 }
 0x3c3   : > { %v638_v2 = vpop.permute.xlu1 %637  ;;  %v660_v0 = vpop.permute.xlu0 %659 }
 0x3c4   : > { %v640_v19 = vsel %vm639_vm2, %v636_v49, %v638_v2  ;;  %v644_v21 = vadd.f32 %v638_v2, %v632_v18 }
 0x3c5   : > { %v643_v23 = vadd.f32 %v640_v19, %v631_v20 }
 0x3c7   : > { %v650_v9 = vpop.permute.xlu1 %649  ;;  %v672_v16 = vpop.permute.xlu0 %671 }
 0x3c8   : > { %v652_v22 = vsel %vm651_vm3, %v648_v57, %v650_v9  ;;  %v656_v25 = vadd.f32 %v650_v9, %v644_v21 }
 0x3c9   : > { %v655_v27 = vadd.f32 %v652_v22, %v643_v23 }
 0x3cb   : > { %v662_v17 = vpop.permute.xlu1 %661  ;;  %v684_v28 = vpop.permute.xlu0 %683 }
 0x3cc   : > { %v664_v26 = vsel %vm663_vm4, %v660_v0, %v662_v17  ;;  %v668_v32 = vadd.f32 %v662_v17, %v656_v25 }
 0x3cd   : > { %v667_v34 = vadd.f32 %v664_v26, %v655_v27 }
 0x3cf   : > { %v674_v24 = vpop.permute.xlu1 %673  ;;  %v696_v42 = vpop.permute.xlu0 %695 }
 0x3d0   : > { %v676_v33 = vsel %vm675_vm5, %v672_v16, %v674_v24  ;;  %v680_v36 = vadd.f32 %v674_v24, %v668_v32 }
 0x3d1   : > { %v679_v38 = vadd.f32 %v676_v33, %v667_v34 }
 0x3d3   : > { %v686_v35 = vpop.permute.xlu1 %685 }
 0x3d4   : > { %v688_v37 = vsel %vm687_vm6, %v684_v28, %v686_v35  ;;  %v692_v41 = vadd.f32 %v686_v35, %v680_v36 }
 0x3d5   : > { %v691_v43 = vadd.f32 %v688_v37, %v679_v38 }
 0x3d7   : > { %v698_v44 = vpop.permute.xlu1 %697 }
 0x3d8   : > { %v700_v45 = vsel %vm699_vm7, %v696_v42, %v698_v44  ;;  %v704_v46 = vadd.f32 %v698_v44, %v692_v41 }
 0x3d9   : > { %v703_v48 = vadd.f32 %v700_v45, %v691_v43 }
 0x3db   : > { %v707_v49 = vcombine.low %v703_v48, %v704_v46 }
 0x3dd   : > { %v714_v50 = vrot.slane %v707_v49, %v713_v47 }
 0x3df   : > { %v721_v51 = vrot.slane %v714_v50, %v713_v47 }
 0x3e1   : > { %727 = vst.msk [vmem:[%s239_s26] sm:$0x3] %vm725_vm8, %v721_v51 }
 0x3e2 PF: > { %s849_s17 = sshll.u32 %s1021_s21, 5  ;;  %s743_s11 = sshll.u32 %s239_s26, 4  ;;  %s744_s11 = int_to_ptr.vmem [resolvable:$true] %s743_s11 }
 0x3e3   : > { %s741_s6 = scalar_lea.hbm %s1271_s5, %s849_s17  ;;  %s729_s13 = scalar_lea.sflag [#allocation6], %s237_s10 }
 0x3e4   : > { %s945_s14 = scalar_lea.vmem %s744_s11, 32  ;;  %s1058_s22 = smov [#allocation5]  }
 0x3e5   : > { %p946_p5 = scmp.ne.s32.totalorder %s744_s11, %s945_s14  ;;  %s949_s15 = sshll.u32 %s1058_s22, 4  ;;  %s950_s15 = int_to_ptr.vmem [resolvable:$false] %s949_s15 }
 0x3e6   : > { %s951_s16 = scalar_lea.vmem %s950_s15, 64  ;;  %p952_p9 = scmp.lt.s32.totalorder %s744_s11, %s950_s15 }
 0x3e7   : > { %p947_p6 = pnand %p946_p5, %p1141_p3  ;;  %p953_p10 = scmp.lt.s32.totalorder %s951_s16, %s945_s14 }
 0x3e9   : > { %p948_p7 = pneg %p947_p6  ;;  %p954_p11 = por %p953_p10, %p952_p9 }
 0x3eb   : > { %p955_p12 = pnand %p954_p11, %p948_p7 }
 0x3ed   : > { %958 = shalt.err (!%p955_p12)
}
 0x3ee   : > { %s959_s21 = scalar_lea.hbm %s741_s6, 32  ;;  %s963_s26 = scalar_lea.hbm %s1271_s5, 64 }
 0x3ef   : > { %p960_p13 = scmp.ne.s32.totalorder %s741_s6, %s959_s21  ;;  %p964_p2 = scmp.lt.s32.totalorder %s741_s6, %s1271_s5 }
 0x3f0   : > { %p965_p4 = scmp.lt.s32.totalorder %s963_s26, %s959_s21 }
 0x3f1   : > { %p961_p0 = pnand %p960_p13, %p1141_p3 }
 0x3f2   : > { %p966_p5 = por %p965_p4, %p964_p2 }
 0x3f3   : > { %p962_p1 = pneg %p961_p0 }
 0x3f5   : > { %p967_p6 = pnand %p966_p5, %p962_p1 }
 0x3f7   : > { %970 = shalt.err (!%p967_p6)
}
 0x3f8   : > { %850 = dma.vmem_to_hbm [thread:$0]  (%p1141_p3), %s744_s11, 32, %s741_s6, %s729_s13  }
 0x3f9 PF: > { %p856_p7 = scmp.ge.s32.totalorder %s1037_s25, 2  ;;  %s755_s30 = sand.u32 1, %s1009_s18  }
 0x3fa   : > { %s756_s14 = scalar_lea.sflag [#allocation6], %s755_s30 }
 0x3fb   : > { %p853_p9 = pnand %p856_p7, %p1152_p8 }
 0x3fd   : > { %p854_p10 = pneg %p853_p9 }
 0x3ff   : > { %1004 = dma.done.wait (%p854_p10), %s756_s14, 32  }
 0x400   : > { %1006 = vsyncadd (%p854_p10), %s756_s14, 4294967264  ;;  %s18_s25 = sadd.s32 1, %s1037_s25   ;;  %s1274_s18 = smov %s1013_s19 }
 0x401   : > { %p15_p11 = scmp.ge.s32.totalorder %s18_s25, 6   ;;  %s1275_s19 = smov %s1017_s20 }
 0x402   : > { %s1276_s20 = smov %s1150_s8  ;;  %s1277_s21 = smov %s1029_s23 }
 0x403   : > { %s1278_s22 = smov %s1033_s24  ;;  %s1279_s23 = smov %s1282_s28 }
 0x404   : > { %s1280_s24 = smov %s1286_s29  ;;  %17 = sbr.rel (!%p15_p11) target bundleno = 5 (0x5), region = 89 }
 0x409   :  { %761 = vsyncpa [#allocation6], 1 }
 0x40a   :  { %763 = vsyncpa [#allocation6 + $0x1], 1 }

</bundles_post_ra>
